<compile_context>
chip_gen: v7x
topology: tpu7x:2x2x1
jax: 0.10.0
libtpu: 0.0.40
codegen_flags: <defaults>
</compile_context>

<pallas_src>
import functools

import jax
import jax.numpy as jnp
from jax.experimental import pallas as pl
from jax.experimental.pallas import tpu as pltpu


def _lstm_fc_kernel(x_ref, w_ih_ref, w_hh_ref, b_ref, w_fc_ref, b_fc_ref,
                    out_ref, *, seq_len, batch_pad, hidden):
    """Full LSTM recurrence + final FC in one kernel invocation.

    x_ref    : (T*Bp, D)   time-major rows; rows t*Bp .. t*Bp+Bp-1 = timestep t
    w_ih_ref : (D, 4H)     input->gates  (PyTorch weight_ih_l0 transposed)
    w_hh_ref : (H, 4H)     hidden->gates (PyTorch weight_hh_l0 transposed)
    b_ref    : (1, 4H)     b_ih + b_hh
    w_fc_ref : (H, Cpad)   fc weight transposed, zero-padded to 128 lanes
    b_fc_ref : (1, Cpad)   fc bias, zero-padded
    out_ref  : (Bp, Cpad)
    """
    T, Bp, H = seq_len, batch_pad, hidden

    # ---- hoisted input projection: one batched MXU matmul, bias folded in --
    gates_x = (jnp.dot(x_ref[...], w_ih_ref[...],
                       preferred_element_type=jnp.float32)
               + b_ref[...])                                   # (T*Bp, 4H) f32

    w_hh = w_hh_ref[...]                                       # hoist ref read

    h = jnp.zeros((Bp, H), jnp.float32)
    c = jnp.zeros((Bp, H), jnp.float32)

    # Fully unrolled static loop: only h @ w_hh is on the serial path.
    # Bp is a multiple of 8 so every slice below is sublane-tile aligned.
    for t in range(T):
        g_x = gates_x[t * Bp:(t + 1) * Bp, :]                  # (Bp, 4H)
        gates = g_x + jnp.dot(h, w_hh, preferred_element_type=jnp.float32)
        sig = jax.nn.sigmoid(gates)                            # EUP pass (i,f,o)
        tnh = jnp.tanh(gates)                                  # EUP pass (g)
        i_g = sig[:, 0 * H:1 * H]
        f_g = sig[:, 1 * H:2 * H]
        g_g = tnh[:, 2 * H:3 * H]
        o_g = sig[:, 3 * H:4 * H]
        c = f_g * c + i_g * g_g
        h = o_g * jnp.tanh(c)

    # Final linear layer on the last hidden state (lane-dense padded output).
    out_ref[...] = (jnp.dot(h, w_fc_ref[...],
                            preferred_element_type=jnp.float32)
                    + b_fc_ref[...]).astype(out_ref.dtype)


def stand_recurrent_forward(x, params, *, mxu_dtype=jnp.float32):
    """x: (B, T, C, 45) float32.  Returns (B, num_classes).

    mxu_dtype: set to jnp.bfloat16 on v6e/v7x to run the bulk (hoisted)
    input-projection matmul on the bf16-native MXU (f32 accumulation kept);
    validate against the reference with a looser tolerance in that case.
    """
    B, T = x.shape[0], x.shape[1]
    D = x.shape[2] * x.shape[3]                      # dims[0] * 45
    H = params["w_hh"].shape[0]                      # hidden size
    C = params["w_fc"].shape[1]                      # num_classes
    C_pad = pl.cdiv(C, 128) * 128                    # lane-dense output slab
    B_pad = pl.cdiv(B, 8) * 8                        # sublane-tile aligned batch

    # Glue (tiny, one-time XLA work): flatten features, go time-major, pad the
    # batch to a full sublane tile and flatten to 2-D so the kernel can do a
    # single (T*Bp, D) @ (D, 4H) matmul with tile-aligned per-step slices.
    x_tm = jnp.transpose(x.reshape(B, T, D), (1, 0, 2))          # (T, B, D)
    x_tm = jnp.pad(x_tm, ((0, 0), (0, B_pad - B), (0, 0)))       # (T, Bp, D)
    x2d = x_tm.reshape(T * B_pad, D).astype(mxu_dtype)
    w_ih = params["w_ih"].astype(mxu_dtype)

    # Pad the FC weight/bias to 128 output lanes (padded cols are exact zeros).
    w_fc = jnp.zeros((H, C_pad), jnp.float32).at[:, :C].set(params["w_fc"])
    b_fc = jnp.zeros((1, C_pad), jnp.float32).at[:, :C].set(params["b_fc"])

    vmem = pl.BlockSpec(memory_space=pltpu.MemorySpace.VMEM)
    kernel = functools.partial(_lstm_fc_kernel, seq_len=T, batch_pad=B_pad,
                               hidden=H)

    out_pad = pl.pallas_call(
        kernel,
        out_shape=jax.ShapeDtypeStruct((B_pad, C_pad), jnp.float32),
        in_specs=[vmem] * 6,
        out_specs=vmem,
        compiler_params=pltpu.CompilerParams(vmem_limit_bytes=64 << 20),
    )(x2d, w_ih, params["w_hh"], params["b"], w_fc, b_fc)

    return out_pad[:B, :C]


def init_params(key, input_size, hidden, num_classes):
    """Deterministic init mimicking PyTorch's U(-1/sqrt(H), 1/sqrt(H))."""
    ks = jax.random.split(key, 6)
    bound = 1.0 / jnp.sqrt(jnp.float32(hidden))
    u = lambda k, shape: jax.random.uniform(k, shape, jnp.float32, -bound, bound)
    # PyTorch stores weight_ih_l0 as (4H, D); we pre-transpose to (D, 4H).
    w_ih = u(ks[0], (4 * hidden, input_size)).T
    w_hh = u(ks[1], (4 * hidden, hidden)).T
    b_ih = u(ks[2], (4 * hidden,))
    b_hh = u(ks[3], (4 * hidden,))
    w_fc = u(ks[4], (num_classes, hidden)).T
    b_fc = u(ks[5], (num_classes,))
    return {
        "w_ih": w_ih,
        "w_hh": w_hh,
        "b": (b_ih + b_hh).reshape(1, 4 * hidden),
        "w_fc": w_fc,
        "b_fc": b_fc.reshape(1, num_classes),
    }


def reference_forward(x, params):
    """Pure-JAX reference of the same LSTM + FC (PyTorch gate order i,f,g,o)."""
    B, T = x.shape[0], x.shape[1]
    D = x.shape[2] * x.shape[3]
    H = params["w_hh"].shape[0]
    xf = x.reshape(B, T, D)
    h = jnp.zeros((B, H), jnp.float32)
    c = jnp.zeros((B, H), jnp.float32)
    for t in range(T):
        gates = xf[:, t] @ params["w_ih"] + h @ params["w_hh"] + params["b"]
        i_g = jax.nn.sigmoid(gates[:, 0 * H:1 * H])
        f_g = jax.nn.sigmoid(gates[:, 1 * H:2 * H])
        g_g = jnp.tanh(gates[:, 2 * H:3 * H])
        o_g = jax.nn.sigmoid(gates[:, 3 * H:4 * H])
        c = f_g * c + i_g * g_g
        h = o_g * jnp.tanh(c)
    return h @ params["w_fc"] + params["b_fc"]


if __name__ == "__main__":
    # dims = (4, 32): input feature size = 4 * 45 = 180, hidden = 32
    B, T, C_in, H, NUM_CLASSES = 2, 8, 4, 32, 5
    D = C_in * 45

    key = jax.random.PRNGKey(0)
    kx, kp = jax.random.split(key)
    x = jax.random.normal(kx, (B, T, C_in, 45), jnp.float32)
    params = init_params(kp, D, H, NUM_CLASSES)

    out = jax.block_until_ready(stand_recurrent_forward(x, params))
    ref = reference_forward(x, params)

    assert out.shape == (B, NUM_CLASSES)
    assert jnp.allclose(out, ref, atol=1e-4, rtol=1e-4), "mismatch vs reference"
    print("KERNEL_OK")
</pallas_src>

<mosaic_0001>
module attributes {stable_mosaic.version = 11 : i64} {
  func.func @_lstm_fc_kernel(%arg0: memref<64x180xf32, #tpu.memory_space<vmem>>, %arg1: memref<180x128xf32, #tpu.memory_space<vmem>>, %arg2: memref<32x128xf32, #tpu.memory_space<vmem>>, %arg3: memref<1x128xf32, #tpu.memory_space<vmem>>, %arg4: memref<32x128xf32, #tpu.memory_space<vmem>>, %arg5: memref<1x128xf32, #tpu.memory_space<vmem>>, %arg6: memref<8x128xf32, #tpu.memory_space<vmem>>) attributes {dimension_semantics = [], scalar_prefetch = 0 : i64, scratch_operands = 0 : i64, tpu.core_type = #tpu.core_type<tc>} {
    %c0 = arith.constant 0 : index
    %c0_0 = arith.constant 0 : index
    %0 = vector.load %arg0[%c0, %c0_0] : memref<64x180xf32, #tpu.memory_space<vmem>>, vector<64x180xf32>
    %c0_1 = arith.constant 0 : index
    %c0_2 = arith.constant 0 : index
    %1 = vector.load %arg1[%c0_1, %c0_2] : memref<180x128xf32, #tpu.memory_space<vmem>>, vector<180x128xf32>
    %cst = arith.constant dense<0.000000e+00> : vector<64x128xf32>
    %2 = tpu.matmul %0, %1, %cst {dimension_numbers = #tpu.dot_dimension_numbers<[1], [0], [0], [1], [0, 0, 1, 1], [], []>} : vector<64x180xf32>, vector<180x128xf32>, vector<64x128xf32> -> vector<64x128xf32>
    %c0_3 = arith.constant 0 : index
    %c0_4 = arith.constant 0 : index
    %3 = vector.load %arg3[%c0_3, %c0_4] : memref<1x128xf32, #tpu.memory_space<vmem>>, vector<1x128xf32>
    %4 = vector.broadcast %3 : vector<1x128xf32> to vector<64x128xf32>
    %5 = arith.addf %2, %4 : vector<64x128xf32>
    %c0_5 = arith.constant 0 : index
    %c0_6 = arith.constant 0 : index
    %6 = vector.load %arg2[%c0_5, %c0_6] : memref<32x128xf32, #tpu.memory_space<vmem>>, vector<32x128xf32>
    %cst_7 = arith.constant 0.000000e+00 : f32
    %7 = vector.broadcast %cst_7 : f32 to vector<8x32xf32>
    %cst_8 = arith.constant 0.000000e+00 : f32
    %8 = vector.broadcast %cst_8 : f32 to vector<8x32xf32>
    %9 = vector.extract_strided_slice %5 {offsets = [0, 0], sizes = [8, 128], strides = [1, 1]} : vector<64x128xf32> to vector<8x128xf32>
    %cst_9 = arith.constant dense<0.000000e+00> : vector<8x128xf32>
    %10 = tpu.matmul %7, %6, %cst_9 {dimension_numbers = #tpu.dot_dimension_numbers<[1], [0], [0], [1], [0, 0, 1, 1], [], []>} : vector<8x32xf32>, vector<32x128xf32>, vector<8x128xf32> -> vector<8x128xf32>
    %11 = arith.addf %9, %10 : vector<8x128xf32>
    %12 = arith.negf %11 : vector<8x128xf32>
    %13 = math.exp %12 : vector<8x128xf32>
    %cst_10 = arith.constant 1.000000e+00 : f32
    %14 = vector.broadcast %cst_10 : f32 to vector<8x128xf32>
    %15 = arith.addf %14, %13 : vector<8x128xf32>
    %16 = arith.divf %14, %15 : vector<8x128xf32>
    %17 = math.tanh %11 : vector<8x128xf32>
    %18 = vector.extract_strided_slice %16 {offsets = [0, 0], sizes = [8, 32], strides = [1, 1]} : vector<8x128xf32> to vector<8x32xf32>
    %19 = vector.extract_strided_slice %16 {offsets = [0, 32], sizes = [8, 32], strides = [1, 1]} : vector<8x128xf32> to vector<8x32xf32>
    %20 = vector.extract_strided_slice %17 {offsets = [0, 64], sizes = [8, 32], strides = [1, 1]} : vector<8x128xf32> to vector<8x32xf32>
    %21 = vector.extract_strided_slice %16 {offsets = [0, 96], sizes = [8, 32], strides = [1, 1]} : vector<8x128xf32> to vector<8x32xf32>
    %22 = arith.mulf %19, %8 : vector<8x32xf32>
    %23 = arith.mulf %18, %20 : vector<8x32xf32>
    %24 = arith.addf %22, %23 : vector<8x32xf32>
    %25 = math.tanh %24 : vector<8x32xf32>
    %26 = arith.mulf %21, %25 : vector<8x32xf32>
    %27 = vector.extract_strided_slice %5 {offsets = [8, 0], sizes = [8, 128], strides = [1, 1]} : vector<64x128xf32> to vector<8x128xf32>
    %cst_11 = arith.constant dense<0.000000e+00> : vector<8x128xf32>
    %28 = tpu.matmul %26, %6, %cst_11 {dimension_numbers = #tpu.dot_dimension_numbers<[1], [0], [0], [1], [0, 0, 1, 1], [], []>} : vector<8x32xf32>, vector<32x128xf32>, vector<8x128xf32> -> vector<8x128xf32>
    %29 = arith.addf %27, %28 : vector<8x128xf32>
    %30 = arith.negf %29 : vector<8x128xf32>
    %31 = math.exp %30 : vector<8x128xf32>
    %cst_12 = arith.constant 1.000000e+00 : f32
    %32 = vector.broadcast %cst_12 : f32 to vector<8x128xf32>
    %33 = arith.addf %32, %31 : vector<8x128xf32>
    %34 = arith.divf %32, %33 : vector<8x128xf32>
    %35 = math.tanh %29 : vector<8x128xf32>
    %36 = vector.extract_strided_slice %34 {offsets = [0, 0], sizes = [8, 32], strides = [1, 1]} : vector<8x128xf32> to vector<8x32xf32>
    %37 = vector.extract_strided_slice %34 {offsets = [0, 32], sizes = [8, 32], strides = [1, 1]} : vector<8x128xf32> to vector<8x32xf32>
    %38 = vector.extract_strided_slice %35 {offsets = [0, 64], sizes = [8, 32], strides = [1, 1]} : vector<8x128xf32> to vector<8x32xf32>
    %39 = vector.extract_strided_slice %34 {offsets = [0, 96], sizes = [8, 32], strides = [1, 1]} : vector<8x128xf32> to vector<8x32xf32>
    %40 = arith.mulf %37, %24 : vector<8x32xf32>
    %41 = arith.mulf %36, %38 : vector<8x32xf32>
    %42 = arith.addf %40, %41 : vector<8x32xf32>
    %43 = math.tanh %42 : vector<8x32xf32>
    %44 = arith.mulf %39, %43 : vector<8x32xf32>
    %45 = vector.extract_strided_slice %5 {offsets = [16, 0], sizes = [8, 128], strides = [1, 1]} : vector<64x128xf32> to vector<8x128xf32>
    %cst_13 = arith.constant dense<0.000000e+00> : vector<8x128xf32>
    %46 = tpu.matmul %44, %6, %cst_13 {dimension_numbers = #tpu.dot_dimension_numbers<[1], [0], [0], [1], [0, 0, 1, 1], [], []>} : vector<8x32xf32>, vector<32x128xf32>, vector<8x128xf32> -> vector<8x128xf32>
    %47 = arith.addf %45, %46 : vector<8x128xf32>
    %48 = arith.negf %47 : vector<8x128xf32>
    %49 = math.exp %48 : vector<8x128xf32>
    %cst_14 = arith.constant 1.000000e+00 : f32
    %50 = vector.broadcast %cst_14 : f32 to vector<8x128xf32>
    %51 = arith.addf %50, %49 : vector<8x128xf32>
    %52 = arith.divf %50, %51 : vector<8x128xf32>
    %53 = math.tanh %47 : vector<8x128xf32>
    %54 = vector.extract_strided_slice %52 {offsets = [0, 0], sizes = [8, 32], strides = [1, 1]} : vector<8x128xf32> to vector<8x32xf32>
    %55 = vector.extract_strided_slice %52 {offsets = [0, 32], sizes = [8, 32], strides = [1, 1]} : vector<8x128xf32> to vector<8x32xf32>
    %56 = vector.extract_strided_slice %53 {offsets = [0, 64], sizes = [8, 32], strides = [1, 1]} : vector<8x128xf32> to vector<8x32xf32>
    %57 = vector.extract_strided_slice %52 {offsets = [0, 96], sizes = [8, 32], strides = [1, 1]} : vector<8x128xf32> to vector<8x32xf32>
    %58 = arith.mulf %55, %42 : vector<8x32xf32>
    %59 = arith.mulf %54, %56 : vector<8x32xf32>
    %60 = arith.addf %58, %59 : vector<8x32xf32>
    %61 = math.tanh %60 : vector<8x32xf32>
    %62 = arith.mulf %57, %61 : vector<8x32xf32>
    %63 = vector.extract_strided_slice %5 {offsets = [24, 0], sizes = [8, 128], strides = [1, 1]} : vector<64x128xf32> to vector<8x128xf32>
    %cst_15 = arith.constant dense<0.000000e+00> : vector<8x128xf32>
    %64 = tpu.matmul %62, %6, %cst_15 {dimension_numbers = #tpu.dot_dimension_numbers<[1], [0], [0], [1], [0, 0, 1, 1], [], []>} : vector<8x32xf32>, vector<32x128xf32>, vector<8x128xf32> -> vector<8x128xf32>
    %65 = arith.addf %63, %64 : vector<8x128xf32>
    %66 = arith.negf %65 : vector<8x128xf32>
    %67 = math.exp %66 : vector<8x128xf32>
    %cst_16 = arith.constant 1.000000e+00 : f32
    %68 = vector.broadcast %cst_16 : f32 to vector<8x128xf32>
    %69 = arith.addf %68, %67 : vector<8x128xf32>
    %70 = arith.divf %68, %69 : vector<8x128xf32>
    %71 = math.tanh %65 : vector<8x128xf32>
    %72 = vector.extract_strided_slice %70 {offsets = [0, 0], sizes = [8, 32], strides = [1, 1]} : vector<8x128xf32> to vector<8x32xf32>
    %73 = vector.extract_strided_slice %70 {offsets = [0, 32], sizes = [8, 32], strides = [1, 1]} : vector<8x128xf32> to vector<8x32xf32>
    %74 = vector.extract_strided_slice %71 {offsets = [0, 64], sizes = [8, 32], strides = [1, 1]} : vector<8x128xf32> to vector<8x32xf32>
    %75 = vector.extract_strided_slice %70 {offsets = [0, 96], sizes = [8, 32], strides = [1, 1]} : vector<8x128xf32> to vector<8x32xf32>
    %76 = arith.mulf %73, %60 : vector<8x32xf32>
    %77 = arith.mulf %72, %74 : vector<8x32xf32>
    %78 = arith.addf %76, %77 : vector<8x32xf32>
    %79 = math.tanh %78 : vector<8x32xf32>
    %80 = arith.mulf %75, %79 : vector<8x32xf32>
    %81 = vector.extract_strided_slice %5 {offsets = [32, 0], sizes = [8, 128], strides = [1, 1]} : vector<64x128xf32> to vector<8x128xf32>
    %cst_17 = arith.constant dense<0.000000e+00> : vector<8x128xf32>
    %82 = tpu.matmul %80, %6, %cst_17 {dimension_numbers = #tpu.dot_dimension_numbers<[1], [0], [0], [1], [0, 0, 1, 1], [], []>} : vector<8x32xf32>, vector<32x128xf32>, vector<8x128xf32> -> vector<8x128xf32>
    %83 = arith.addf %81, %82 : vector<8x128xf32>
    %84 = arith.negf %83 : vector<8x128xf32>
    %85 = math.exp %84 : vector<8x128xf32>
    %cst_18 = arith.constant 1.000000e+00 : f32
    %86 = vector.broadcast %cst_18 : f32 to vector<8x128xf32>
    %87 = arith.addf %86, %85 : vector<8x128xf32>
    %88 = arith.divf %86, %87 : vector<8x128xf32>
    %89 = math.tanh %83 : vector<8x128xf32>
    %90 = vector.extract_strided_slice %88 {offsets = [0, 0], sizes = [8, 32], strides = [1, 1]} : vector<8x128xf32> to vector<8x32xf32>
    %91 = vector.extract_strided_slice %88 {offsets = [0, 32], sizes = [8, 32], strides = [1, 1]} : vector<8x128xf32> to vector<8x32xf32>
    %92 = vector.extract_strided_slice %89 {offsets = [0, 64], sizes = [8, 32], strides = [1, 1]} : vector<8x128xf32> to vector<8x32xf32>
    %93 = vector.extract_strided_slice %88 {offsets = [0, 96], sizes = [8, 32], strides = [1, 1]} : vector<8x128xf32> to vector<8x32xf32>
    %94 = arith.mulf %91, %78 : vector<8x32xf32>
    %95 = arith.mulf %90, %92 : vector<8x32xf32>
    %96 = arith.addf %94, %95 : vector<8x32xf32>
    %97 = math.tanh %96 : vector<8x32xf32>
    %98 = arith.mulf %93, %97 : vector<8x32xf32>
    %99 = vector.extract_strided_slice %5 {offsets = [40, 0], sizes = [8, 128], strides = [1, 1]} : vector<64x128xf32> to vector<8x128xf32>
    %cst_19 = arith.constant dense<0.000000e+00> : vector<8x128xf32>
    %100 = tpu.matmul %98, %6, %cst_19 {dimension_numbers = #tpu.dot_dimension_numbers<[1], [0], [0], [1], [0, 0, 1, 1], [], []>} : vector<8x32xf32>, vector<32x128xf32>, vector<8x128xf32> -> vector<8x128xf32>
    %101 = arith.addf %99, %100 : vector<8x128xf32>
    %102 = arith.negf %101 : vector<8x128xf32>
    %103 = math.exp %102 : vector<8x128xf32>
    %cst_20 = arith.constant 1.000000e+00 : f32
    %104 = vector.broadcast %cst_20 : f32 to vector<8x128xf32>
    %105 = arith.addf %104, %103 : vector<8x128xf32>
    %106 = arith.divf %104, %105 : vector<8x128xf32>
    %107 = math.tanh %101 : vector<8x128xf32>
    %108 = vector.extract_strided_slice %106 {offsets = [0, 0], sizes = [8, 32], strides = [1, 1]} : vector<8x128xf32> to vector<8x32xf32>
    %109 = vector.extract_strided_slice %106 {offsets = [0, 32], sizes = [8, 32], strides = [1, 1]} : vector<8x128xf32> to vector<8x32xf32>
    %110 = vector.extract_strided_slice %107 {offsets = [0, 64], sizes = [8, 32], strides = [1, 1]} : vector<8x128xf32> to vector<8x32xf32>
    %111 = vector.extract_strided_slice %106 {offsets = [0, 96], sizes = [8, 32], strides = [1, 1]} : vector<8x128xf32> to vector<8x32xf32>
    %112 = arith.mulf %109, %96 : vector<8x32xf32>
    %113 = arith.mulf %108, %110 : vector<8x32xf32>
    %114 = arith.addf %112, %113 : vector<8x32xf32>
    %115 = math.tanh %114 : vector<8x32xf32>
    %116 = arith.mulf %111, %115 : vector<8x32xf32>
    %117 = vector.extract_strided_slice %5 {offsets = [48, 0], sizes = [8, 128], strides = [1, 1]} : vector<64x128xf32> to vector<8x128xf32>
    %cst_21 = arith.constant dense<0.000000e+00> : vector<8x128xf32>
    %118 = tpu.matmul %116, %6, %cst_21 {dimension_numbers = #tpu.dot_dimension_numbers<[1], [0], [0], [1], [0, 0, 1, 1], [], []>} : vector<8x32xf32>, vector<32x128xf32>, vector<8x128xf32> -> vector<8x128xf32>
    %119 = arith.addf %117, %118 : vector<8x128xf32>
    %120 = arith.negf %119 : vector<8x128xf32>
    %121 = math.exp %120 : vector<8x128xf32>
    %cst_22 = arith.constant 1.000000e+00 : f32
    %122 = vector.broadcast %cst_22 : f32 to vector<8x128xf32>
    %123 = arith.addf %122, %121 : vector<8x128xf32>
    %124 = arith.divf %122, %123 : vector<8x128xf32>
    %125 = math.tanh %119 : vector<8x128xf32>
    %126 = vector.extract_strided_slice %124 {offsets = [0, 0], sizes = [8, 32], strides = [1, 1]} : vector<8x128xf32> to vector<8x32xf32>
    %127 = vector.extract_strided_slice %124 {offsets = [0, 32], sizes = [8, 32], strides = [1, 1]} : vector<8x128xf32> to vector<8x32xf32>
    %128 = vector.extract_strided_slice %125 {offsets = [0, 64], sizes = [8, 32], strides = [1, 1]} : vector<8x128xf32> to vector<8x32xf32>
    %129 = vector.extract_strided_slice %124 {offsets = [0, 96], sizes = [8, 32], strides = [1, 1]} : vector<8x128xf32> to vector<8x32xf32>
    %130 = arith.mulf %127, %114 : vector<8x32xf32>
    %131 = arith.mulf %126, %128 : vector<8x32xf32>
    %132 = arith.addf %130, %131 : vector<8x32xf32>
    %133 = math.tanh %132 : vector<8x32xf32>
    %134 = arith.mulf %129, %133 : vector<8x32xf32>
    %135 = vector.extract_strided_slice %5 {offsets = [56, 0], sizes = [8, 128], strides = [1, 1]} : vector<64x128xf32> to vector<8x128xf32>
    %cst_23 = arith.constant dense<0.000000e+00> : vector<8x128xf32>
    %136 = tpu.matmul %134, %6, %cst_23 {dimension_numbers = #tpu.dot_dimension_numbers<[1], [0], [0], [1], [0, 0, 1, 1], [], []>} : vector<8x32xf32>, vector<32x128xf32>, vector<8x128xf32> -> vector<8x128xf32>
    %137 = arith.addf %135, %136 : vector<8x128xf32>
    %138 = arith.negf %137 : vector<8x128xf32>
    %139 = math.exp %138 : vector<8x128xf32>
    %cst_24 = arith.constant 1.000000e+00 : f32
    %140 = vector.broadcast %cst_24 : f32 to vector<8x128xf32>
    %141 = arith.addf %140, %139 : vector<8x128xf32>
    %142 = arith.divf %140, %141 : vector<8x128xf32>
    %143 = math.tanh %137 : vector<8x128xf32>
    %144 = vector.extract_strided_slice %142 {offsets = [0, 0], sizes = [8, 32], strides = [1, 1]} : vector<8x128xf32> to vector<8x32xf32>
    %145 = vector.extract_strided_slice %142 {offsets = [0, 32], sizes = [8, 32], strides = [1, 1]} : vector<8x128xf32> to vector<8x32xf32>
    %146 = vector.extract_strided_slice %143 {offsets = [0, 64], sizes = [8, 32], strides = [1, 1]} : vector<8x128xf32> to vector<8x32xf32>
    %147 = vector.extract_strided_slice %142 {offsets = [0, 96], sizes = [8, 32], strides = [1, 1]} : vector<8x128xf32> to vector<8x32xf32>
    %148 = arith.mulf %145, %132 : vector<8x32xf32>
    %149 = arith.mulf %144, %146 : vector<8x32xf32>
    %150 = arith.addf %148, %149 : vector<8x32xf32>
    %151 = math.tanh %150 : vector<8x32xf32>
    %152 = arith.mulf %147, %151 : vector<8x32xf32>
    %c0_25 = arith.constant 0 : index
    %c0_26 = arith.constant 0 : index
    %153 = vector.load %arg4[%c0_25, %c0_26] : memref<32x128xf32, #tpu.memory_space<vmem>>, vector<32x128xf32>
    %cst_27 = arith.constant dense<0.000000e+00> : vector<8x128xf32>
    %154 = tpu.matmul %152, %153, %cst_27 {dimension_numbers = #tpu.dot_dimension_numbers<[1], [0], [0], [1], [0, 0, 1, 1], [], []>} : vector<8x32xf32>, vector<32x128xf32>, vector<8x128xf32> -> vector<8x128xf32>
    %c0_28 = arith.constant 0 : index
    %c0_29 = arith.constant 0 : index
    %155 = vector.load %arg5[%c0_28, %c0_29] : memref<1x128xf32, #tpu.memory_space<vmem>>, vector<1x128xf32>
    %156 = vector.broadcast %155 : vector<1x128xf32> to vector<8x128xf32>
    %157 = arith.addf %154, %156 : vector<8x128xf32>
    %c0_30 = arith.constant 0 : index
    %c0_31 = arith.constant 0 : index
    %158 = vector.load %arg6[%c0_30, %c0_31] : memref<8x128xf32, #tpu.memory_space<vmem>>, vector<8x128xf32>
    tpu.vector_store %arg6[%c0_30, %c0_31], %157 {strides = array<i32>} : memref<8x128xf32, #tpu.memory_space<vmem>>, vector<8x128xf32>,
    return
  }
}

</mosaic_0001>

<bundles_post_ra>
// kernel: tpu_custom_call.1
= control target key start
LH: loop header
LB: loop body
LE: loop exit
PB: predicated region body
PF: predicated region fallthrough
CT: control target
= control target key end

     0   :  { %11 = vsyncpa [#allocation3], 0  ;;  %s1979_s0 = inlined_call_operand.hbm [shape: f32[64,180], index: 0, kind: input, shape index: {}]   ;;  %s1980_s1 = inlined_call_operand.hbm [shape: f32[180,128], index: 1, kind: input, shape index: {}]   ;;  %s1981_s2 = inlined_call_operand.hbm [shape: f32[32,128], index: 2, kind: input, shape index: {}]   ;;  %s1982_s3 = inlined_call_operand.hbm [shape: f32[1,128], index: 3, kind: input, shape index: {}]   ;;  %s1983_s4 = inlined_call_operand.hbm [shape: f32[32,128], index: 4, kind: input, shape index: {}]   ;;  %s1984_s5 = inlined_call_operand.hbm [shape: f32[1,128], index: 5, kind: input, shape index: {}]   ;;  %s1985_s6 = inlined_call_operand.hbm [shape: f32[8,128], index: 6, kind: output, shape index: {}]  }
   0x1   :  { %12 = vsyncpa [#allocation6], 0 }
   0x2   :  { %13 = vsyncpa [#allocation9], 0 }
   0x3   :  { %14 = vsyncpa [#allocation12], 0 }
   0x4   :  { %15 = vsyncpa [#allocation4], 0  ;;  %s1708_s21 = smov [#allocation5]   ;;  %s1544_s25 = scalar_lea.hbm %s1980_s1, 2944 }
   0x5   :  { %s33_s22 = sshll.u32 %s1708_s21, 4  ;;  %p1545_p0 = scmp.ne.s32.totalorder %s1980_s1, %s1544_s25  ;;  %s34_s22 = int_to_ptr.vmem [resolvable:$true] %s33_s22 }
   0x6   :  { %p1548_p1 = scmp.lt.u32.totalorder %s1544_s25, %s1980_s1 }
   0x8   :  { %p1550_p2 = pnand %p1548_p1, %p1545_p0 }
   0xa   :  { %1553 = shalt.err (!%p1550_p2)
}
   0xb   :  { %s1554_s30 = scalar_lea.vmem %s34_s22, 2944  ;;  %p1559_p4 = scmp.lt.s32.totalorder %s34_s22, %s34_s22 }
   0xc   :  { %p1555_p3 = scmp.ne.s32.totalorder %s34_s22, %s1554_s30  ;;  %p1560_p5 = scmp.lt.s32.totalorder %s1554_s30, %s1554_s30 }
   0xe   :  { %p1561_p6 = por %p1560_p5, %p1559_p4 }
  0x10   :  { %p1562_p7 = pnand %p1561_p6, %p1555_p3 }
  0x12   :  { %1565 = shalt.err (!%p1562_p7)
}
  0x13   :  { %s1709_s7 = smov 128   ;;  %s1710_s8 = smov 8  }
  0x14   :  { %39 = dma.hbm_to_vmem [thread:$0]  %s1980_s1, 2944, %s34_s22, [#allocation6], %s1709_s7, %s1709_s7, %s1710_s8  }
  0x15   :  { %s1711_s11 = smov [#allocation8]   ;;  %s1712_s13 = smov [#allocation2]  }
  0x16   :  { %s58_s12 = sshll.u32 %s1711_s11, 4  ;;  %s21_s14 = sshll.u32 %s1712_s13, 4  ;;  %s59_s12 = int_to_ptr.vmem [resolvable:$true] %s58_s12  ;;  %s22_s14 = int_to_ptr.vmem [resolvable:$true] %s21_s14 }
  0x17   :  { %s1566_s17 = scalar_lea.hbm %s1982_s3, 16 }
  0x18   :  { %p1567_p8 = scmp.ne.s32.totalorder %s1982_s3, %s1566_s17  ;;  %p1570_p9 = scmp.lt.u32.totalorder %s1566_s17, %s1982_s3 }
  0x1a   :  { %p1572_p10 = pnand %p1570_p9, %p1567_p8 }
  0x1c   :  { %1575 = shalt.err (!%p1572_p10)
}
  0x1d   :  { %s1576_s1 = scalar_lea.vmem %s59_s12, 16  ;;  %s1580_s22 = scalar_lea.vmem %s59_s12, 32 }
  0x1e   :  { %p1577_p11 = scmp.ne.s32.totalorder %s59_s12, %s1576_s1  ;;  %p1581_p12 = scmp.lt.s32.totalorder %s59_s12, %s59_s12 }
  0x1f   :  { %p1582_p13 = scmp.lt.s32.totalorder %s1580_s22, %s1576_s1 }
  0x21   :  { %p1583_p0 = por %p1582_p13, %p1581_p12 }
  0x23   :  { %p1584_p1 = pnand %p1583_p0, %p1577_p11 }
  0x25   :  { %1587 = shalt.err (!%p1584_p1)
}
  0x26   :  { %61 = dma.hbm_to_vmem [thread:$0]  %s1982_s3, 16, %s59_s12, [#allocation9]  }
  0x27   :  { %s1588_s27 = scalar_lea.hbm %s1979_s0, 2048 }
  0x28   :  { %p1589_p2 = scmp.ne.s32.totalorder %s1979_s0, %s1588_s27  ;;  %p1592_p3 = scmp.lt.u32.totalorder %s1588_s27, %s1979_s0 }
  0x2a   :  { %p1594_p4 = pnand %p1592_p3, %p1589_p2 }
  0x2c   :  { %1597 = shalt.err (!%p1594_p4)
}
  0x2d   :  { %s1598_s10 = scalar_lea.vmem %s22_s14, 2048  ;;  %p1603_p6 = scmp.lt.s32.totalorder %s22_s14, %s22_s14 }
  0x2e   :  { %p1599_p5 = scmp.ne.s32.totalorder %s22_s14, %s1598_s10  ;;  %p1604_p7 = scmp.lt.s32.totalorder %s1598_s10, %s1598_s10 }
  0x30   :  { %p1605_p8 = por %p1604_p7, %p1603_p6 }
  0x32   :  { %p1606_p9 = pnand %p1605_p8, %p1599_p5 }
  0x34   :  { %1609 = shalt.err (!%p1606_p9)
}
  0x35   :  { %s1713_s3 = smov 256   ;;  %s1714_s11 = smov 16  }
  0x36   :  { %27 = dma.hbm_to_vmem [thread:$0]  %s1979_s0, 2048, %s22_s14, [#allocation3], %s1713_s3, %s1713_s3, %s1714_s11  }
  0x37   :  { %s1715_s15 = smov [#allocation7]   ;;  %s1716_s17 = smov [#allocation10]  }
  0x38   :  { %s45_s16 = sshll.u32 %s1715_s15, 4  ;;  %s67_s18 = sshll.u32 %s1716_s17, 4  ;;  %s46_s16 = int_to_ptr.vmem [resolvable:$true] %s45_s16  ;;  %s68_s18 = int_to_ptr.vmem [resolvable:$true] %s67_s18 }
  0x39   :  { %s1610_s21 = scalar_lea.hbm %s1981_s2, 512 }
  0x3a   :  { %p1611_p10 = scmp.ne.s32.totalorder %s1981_s2, %s1610_s21  ;;  %p1614_p11 = scmp.lt.u32.totalorder %s1610_s21, %s1981_s2 }
  0x3c   :  { %p1616_p12 = pnand %p1614_p11, %p1611_p10 }
  0x3e   :  { %1619 = shalt.err (!%p1616_p12)
}
  0x3f   :  { %s1620_s0 = scalar_lea.vmem %s46_s16, 512  ;;  %p1625_p0 = scmp.lt.s32.totalorder %s46_s16, %s46_s16 }
  0x40   :  { %p1621_p13 = scmp.ne.s32.totalorder %s46_s16, %s1620_s0  ;;  %p1626_p1 = scmp.lt.s32.totalorder %s1620_s0, %s1620_s0 }
  0x42   :  { %p1627_p2 = por %p1626_p1, %p1625_p0 }
  0x44   :  { %p1628_p3 = pnand %p1627_p2, %p1621_p13 }
  0x46   :  { %1631 = shalt.err (!%p1628_p3)
}
  0x47   :  { %51 = dma.hbm_to_vmem [thread:$0]  %s1981_s2, 512, %s46_s16, [#allocation6], %s1709_s7, %s1709_s7, %s1710_s8  }
  0x48   :  { %s1632_s28 = scalar_lea.hbm %s1983_s4, 512 }
  0x49   :  { %p1633_p4 = scmp.ne.s32.totalorder %s1983_s4, %s1632_s28  ;;  %p1636_p5 = scmp.lt.u32.totalorder %s1632_s28, %s1983_s4 }
  0x4b   :  { %p1638_p6 = pnand %p1636_p5, %p1633_p4 }
  0x4d   :  { %1641 = shalt.err (!%p1638_p6)
}
  0x4e   :  { %s1642_s3 = scalar_lea.vmem %s68_s18, 512  ;;  %p1647_p8 = scmp.lt.s32.totalorder %s68_s18, %s68_s18 }
  0x4f   :  { %p1643_p7 = scmp.ne.s32.totalorder %s68_s18, %s1642_s3  ;;  %p1648_p9 = scmp.lt.s32.totalorder %s1642_s3, %s1642_s3 }
  0x51   :  { %p1649_p10 = por %p1648_p9, %p1647_p8 }
  0x53   :  { %p1650_p11 = pnand %p1649_p10, %p1643_p7 }
  0x55   :  { %1653 = shalt.err (!%p1650_p11)
}
  0x56   :  { %73 = dma.hbm_to_vmem [thread:$0]  %s1983_s4, 512, %s68_s18, [#allocation9], %s1709_s7, %s1709_s7, %s1710_s8  }
  0x57   :  { %s1717_s12 = smov [#allocation11]   ;;  %s1654_s17 = scalar_lea.hbm %s1984_s5, 16 }
  0x58   :  { %s80_s13 = sshll.u32 %s1717_s12, 4  ;;  %p1655_p12 = scmp.ne.s32.totalorder %s1984_s5, %s1654_s17  ;;  %s81_s13 = int_to_ptr.vmem [resolvable:$true] %s80_s13 }
  0x59   :  { %p1658_p13 = scmp.lt.u32.totalorder %s1654_s17, %s1984_s5 }
  0x5b   :  { %p1660_p0 = pnand %p1658_p13, %p1655_p12 }
  0x5d   :  { %1663 = shalt.err (!%p1660_p0)
}
  0x5e   :  { %s1664_s22 = scalar_lea.vmem %s81_s13, 16  ;;  %s1668_s4 = scalar_lea.vmem %s81_s13, 32 }
  0x5f   :  { %p1665_p1 = scmp.ne.s32.totalorder %s81_s13, %s1664_s22  ;;  %p1669_p2 = scmp.lt.s32.totalorder %s81_s13, %s81_s13 }
  0x60   :  { %p1670_p3 = scmp.lt.s32.totalorder %s1668_s4, %s1664_s22 }
  0x62   :  { %p1671_p4 = por %p1670_p3, %p1669_p2 }
  0x64   :  { %p1672_p5 = pnand %p1671_p4, %p1665_p1 }
  0x66   :  { %1675 = shalt.err (!%p1672_p5)
}
  0x67   :  { %83 = dma.hbm_to_vmem [thread:$0]  %s1984_s5, 16, %s81_s13, [#allocation12]  }
  0x68   :  { %1698 = dma.done.wait [#allocation3], 2048  }
  0x69   :  { %1699 = vsyncadd [#allocation3], 4294965248 }
  0x6a   :  { %1700 = dma.done.wait [#allocation6], 3456  }
  0x6b   :  { %1701 = vsyncadd [#allocation6], 4294963840 }
  0x6c   :  { %1702 = dma.done.wait [#allocation9], 528  }
  0x6d   :  { %1703 = vsyncadd [#allocation9], 4294966768 }
  0x6e   :  { %1704 = dma.done.wait [#allocation12], 16  }
  0x6f   :  { %1705 = vsyncadd [#allocation12], 4294967280  ;;  %v1718_v0 = vmov 0.0|0.0   ;;  %vm1719_vm0 = vmmov 0   ;;  %v1720_v1 = vmov 0.0   ;;  %v118_v2 = vld [vmem:[#allocation5] sm:$0xff] }
  0x70   :  { %1361 = vmatprep.subr.bf16.mxu1 %v1718_v0  ;;  %1394 = vmatprep.subr.bf16.mxu0 %v1718_v0  ;;  %v119_v3 = vld [vmem:[#allocation5 + $0x8] sm:$0xff]  ;;  %v120_v4 = vld [vmem:[#allocation5 + $0x10] sm:$0xff]  ;;  %v121_v6 = vld [vmem:[#allocation5 + $0x18] sm:$0xff]  ;;  %vm148_vm1 = vcmask 424960   ;;  %vm173_vm2 = vcmask 1043456   ;;  %s1721_s5 = smov 64  }
  0x71   :  { %1270 = vmatprep.mubr.msk.f32.mxu0 %vm1719_vm0, %v1720_v1  ;;  %v1362_v5 = vpack.c.bf16 %v119_v3, %v118_v2  ;;  %v1365_v7 = vpack.c.bf16 %v121_v6, %v120_v4  ;;  %v122_v8 = vld [vmem:[#allocation5 + $0x20] sm:$0xff]  ;;  %v123_v9 = vld [vmem:[#allocation5 + $0x28] sm:$0xff]  ;;  %v282_v10 = vld [vmem:[#allocation7] sm:$0xff]  ;;  %s1722_s18 = smov 32   ;;  %vm286_vm3 = vcmask 261120   ;;  %s1723_s23 = smov [#allocation13]  }
  0x72   :  { %v1368_v11 = vpack.c.bf16 %v123_v9, %v122_v8  ;;  %v124_v12 = vld [vmem:[#allocation5 + $0x30] sm:$0xff]  ;;  %v283_v13 = vld [vmem:[#allocation7 + $0x8] sm:$0xff]  ;;  %v125_v14 = vld [vmem:[#allocation5 + $0x38] sm:$0xff]  ;;  %s1178_s24 = sshll.u32 %s1723_s23, 4  ;;  %s1179_s24 = int_to_ptr.vmem [resolvable:$true] %s1178_s24 }
  0x73   :  { %1363 = vmatpush1.bf16.msra.mxu1 %v1362_v5  ;;  %v1846_v15 = vpack.c.bf16 %v283_v13, %v282_v10  ;;  %v284_v16 = vld [vmem:[#allocation7 + $0x10] sm:$0xff]  ;;  %v285_v17 = vld [vmem:[#allocation7 + $0x18] sm:$0xff]  ;;  %v1371_v20 = vpack.c.bf16 %v125_v14, %v124_v12  ;;  %v126_v21 = vld [vmem:[#allocation5 + $0x40] sm:$0xff]  ;;  %s1676_s0 = scalar_lea.vmem %s1179_s24, 128  ;;  %p1681_p7 = scmp.lt.s32.totalorder %s1179_s24, %s1179_s24 }
  0x74   :  { %1364 = vmatprep.subr.bf16.mxu1 %v1718_v0  ;;  %v103_v18 = vld [vmem:[#allocation2 + $0x8] sm:$0xff]  ;;  %v1849_v19 = vpack.c.bf16 %v285_v17, %v284_v16  ;;  %v128_v24 = vld [vmem:[#allocation5 + $0x50] sm:$0xff]  ;;  %v129_v25 = vld [vmem:[#allocation5 + $0x58] sm:$0xff]  ;;  %p1677_p6 = scmp.ne.s32.totalorder %s1179_s24, %s1676_s0  ;;  %p1682_p8 = scmp.lt.s32.totalorder %s1676_s0, %s1676_s0 }
  0x75   :  { %1396 = vmatpush3.bf16.msra.mxu0 %v1846_v15  ;;  %1192 = vmatprep.mubr.msk.f32.mxu1 %vm148_vm1, %v103_v18  ;;  %v127_v22 = vld [vmem:[#allocation5 + $0x48] sm:$0xff]  ;;  %v1377_v26 = vpack.c.bf16 %v129_v25, %v128_v24  ;;  %v130_v27 = vld [vmem:[#allocation5 + $0x60] sm:$0xff]  ;;  %v132_v30 = vld [vmem:[#allocation5 + $0x70] sm:$0xff] }
  0x76   :  { %1397 = vmatprep.subr.bf16.mxu0 %v1718_v0  ;;  %v1374_v23 = vpack.c.bf16 %v127_v22, %v126_v21  ;;  %v131_v28 = vld [vmem:[#allocation5 + $0x68] sm:$0xff]  ;;  %v133_v31 = vld [vmem:[#allocation5 + $0x78] sm:$0xff]  ;;  %v134_v33 = vld [vmem:[#allocation5 + $0x80] sm:$0xff]  ;;  %p1683_p9 = por %p1682_p8, %p1681_p7 }
  0x77   :  { %1366 = vmatpush1.bf16.msra.mxu1 %v1365_v7  ;;  %v1380_v29 = vpack.c.bf16 %v131_v28, %v130_v27  ;;  %v1383_v32 = vpack.c.bf16 %v133_v31, %v132_v30  ;;  %v135_v34 = vld [vmem:[#allocation5 + $0x88] sm:$0xff]  ;;  %v136_v36 = vld [vmem:[#allocation5 + $0x90] sm:$0xff]  ;;  %v137_v37 = vld [vmem:[#allocation5 + $0x98] sm:$0xff] }
  0x78   :  { %1367 = vmatprep.subr.bf16.mxu1 %v1718_v0  ;;  %v1386_v35 = vpack.c.bf16 %v135_v34, %v134_v33  ;;  %v1389_v38 = vpack.c.bf16 %v137_v37, %v136_v36  ;;  %v138_v39 = vld [vmem:[#allocation5 + $0xa0] sm:$0xff]  ;;  %v139_v40 = vld [vmem:[#allocation5 + $0xa8] sm:$0xff]  ;;  %v140_v42 = vld [vmem:[#allocation5 + $0xb0] sm:$0xf]  ;;  %p1684_p10 = pnand %p1683_p9, %p1677_p6 }
  0x79   :  { %1399 = vmatpush3.bf16.msra.mxu0 %v1849_v19  ;;  %v1392_v41 = vpack.c.bf16 %v139_v40, %v138_v39  ;;  %v102_v43 = vld [vmem:[#allocation2] sm:$0xff]  ;;  %v1871_v46 = vld [vmem:[#allocation8] ss:$0 sm:$0xff]  ;;  %v104_v62 = vld [vmem:[#allocation2 + $0x10] sm:$0xff] }
  0x7a   :  { %1400 = vmatprep.subr.bf16.mxu0 %v1718_v0  ;;  %v105_v61 = vld [vmem:[#allocation2 + $0x18] sm:$0xff]  ;;  %v106_v24 = vld [vmem:[#allocation2 + $0x20] sm:$0xff] }
  0x7b   :  { %1369 = vmatpush1.bf16.msra.mxu1 %v1368_v11 }
  0x7c   :  { %1370 = vmatprep.subr.bf16.mxu1 %v1718_v0  ;;  %1271 = vmatmul.mubr.f32.vlgmr.msra.gmra.mrb[0].mxu0 %v1720_v1 }
  0x7d   :  { %1402 = vmatpush3.bf16.msra.mxu0 %v1846_v15  ;;  %1281 = vmatprep.mubr.msk.f32.mxu0 %vm1719_vm0, %v1720_v1 }
  0x7e   :  { %1403 = vmatprep.subr.bf16.mxu0 %v1718_v0 }
  0x7f   :  { %1372 = vmatpush1.bf16.msra.mxu1 %v1371_v20 }
  0x80   :  { %1373 = vmatprep.subr.bf16.mxu1 %v1718_v0 }
  0x81   :  { %1405 = vmatpush3.bf16.msra.mxu0 %v1849_v19 }
  0x82   :  { %1406 = vmatprep.subr.bf16.mxu0 %v1718_v0 }
  0x83   :  { %1375 = vmatpush1.bf16.msra.mxu1 %v1374_v23  ;;  %v107_v23 = vld [vmem:[#allocation2 + $0x28] sm:$0xff] }
  0x84   :  { %1376 = vmatprep.subr.bf16.mxu1 %v1718_v0 }
  0x87   :  { %1378 = vmatpush1.bf16.msra.mxu1 %v1377_v26 }
  0x88   :  { %1379 = vmatprep.subr.bf16.mxu1 %v1718_v0 }
  0x8b   :  { %1381 = vmatpush1.bf16.msra.mxu1 %v1380_v29 }
  0x8c   :  { %1382 = vmatprep.subr.bf16.mxu1 %v1718_v0 }
  0x8f   :  { %1384 = vmatpush1.bf16.msra.mxu1 %v1383_v32 }
  0x90   :  { %1385 = vmatprep.subr.bf16.mxu1 %v1718_v0 }
  0x93   :  { %1387 = vmatpush1.bf16.msra.mxu1 %v1386_v35 }
  0x94   :  { %1388 = vmatprep.subr.bf16.mxu1 %v1718_v0 }
  0x97   :  { %1390 = vmatpush1.bf16.msra.mxu1 %v1389_v38 }
  0x98   :  { %1391 = vmatprep.subr.bf16.mxu1 %v1718_v0 }
  0x9b   :  { %1393 = vmatpush1.bf16.msra.mxu1 %v1392_v41 }
  0x9c   :  { %221 = vmatprep.subr.mxu1 %v1720_v1 }
  0x9f   :  { %1191 = vmatpush1.msk.msra.mxu1 %vm173_vm2, %v140_v42 }
  0xa0   :  { %242 = vmatmul.mubr.f32.vlgmr.msra.gmra.mrb[0].mxu1 %v102_v43 }
  0xa1   :  { %1193 = vmatprep.mubr.msk.f32.mxu1 %vm148_vm1, %v105_v61 }
  0xa4   :  { %247 = vmatmul.mubr.f32.gmra.mrb[2].mxu1 %v104_v62 }
  0xa5   :  { %1194 = vmatprep.mubr.msk.f32.mxu1 %vm148_vm1, %v107_v23 }
  0xa8   :  { %252 = vmatmul.mubr.f32.gmra.mrb[4].mxu1 %v106_v24 }
 0x14f   :  { %v356_v44 = vpop.f32.mrb[0].mxu0 }
 0x150   :  { %v1272_v45 = vpop.f32.mrb[1].mxu0 }
 0x151   :  { %v109_v45 = vld [vmem:[#allocation2 + $0x38] sm:$0xff] }
 0x152   :  { %1195 = vmatprep.mubr.msk.f32.mxu1 %vm148_vm1, %v109_v45 }
 0x173   :  { %v243_v47 = vpop.f32.mrb[0].mxu1 }
 0x174   :  { %v244_v48 = vadd.f32 %v1871_v46, %v243_v47  ;;  %v245_v49 = vpop.f32.mrb[1].mxu1  ;;  %v108_v47 = vld [vmem:[#allocation2 + $0x30] sm:$0xff] }
 0x175   :  { %257 = vmatmul.mubr.f32.gmra.mrb[6].mxu1 %v108_v47 }
 0x176   :  { %v360_v50 = vadd.f32 %v356_v44, %v244_v48 }
 0x177   :  { %v248_v4 = vpop.f32.mrb[2].mxu1 }
 0x178   :  { %1480 = vtanh.f32 %v360_v50  ;;  %v1200_v52 = vmul.f32 -1.442695, %v360_v50  ;;  %v250_v5 = vpop.f32.mrb[3].mxu1  ;;  %v249_v7 = vadd.f32 %v1871_v46, %v248_v4 }
 0x17a   :  { %1482 = vpow2.f32 %v1200_v52 }
 0x17b   :  { %v253_v28 = vpop.f32.mrb[4].mxu1 }
 0x17c   :  { %v255_v29 = vpop.f32.mrb[5].mxu1  ;;  %v254_v31 = vadd.f32 %v1871_v46, %v253_v28 }
 0x182   :  { %v1481_v51 = vpop.eup %1480 }
 0x183   :  { %370 = vrot.lane.b32.xlu0 %v1481_v51, %s1721_s5 }
 0x184   :  { %v1483_v53 = vpop.eup %1482 }
 0x185   :  { %v364_v54 = vadd.f32 1.0, %v1483_v53 }
 0x187   :  { %1484 = vrcp.f32 %v364_v54 }
 0x191   :  { %v1485_v55 = vpop.eup %1484 }
 0x192   :  { %v368_v58 = vmul.f32 0.0, %v1485_v55 }
 0x1f5   :  { %v371_v56 = vpop.permute.xlu0 %370 }
 0x1f6   :  { %v373_v57 = vmul.f32 %v1485_v55, %v371_v56 }
 0x1f8   :  { %375 = vrot.lane.b32.xlu0 %v373_v57, %s1722_s18 }
 0x248   :  { %v258_v51 = vpop.f32.mrb[6].mxu1 }
 0x249   :  { %v260_v52 = vpop.f32.mrb[7].mxu1  ;;  %v259_v54 = vadd.f32 %v1871_v46, %v258_v51 }
 0x26a   :  { %v376_v59 = vpop.permute.xlu0 %375 }
 0x26b   :  { %v378_v60 = vadd.f32 %v376_v59, %v368_v58 }
 0x26d   :  { %1486 = vtanh.f32 %v378_v60 }
 0x277   :  { %v1487_v63 = vpop.eup %1486 }
 0x278   :  { %381 = vrot.lane.b32.xlu1 %v1487_v63, %s1721_s5 }
 0x2ea   :  { %v382_v2 = vpop.permute.xlu1 %381 }
 0x2eb   :  { %v384_v3 = vmul.f32 %v1485_v55, %v382_v2 }
 0x2ed   :  { %386 = vrot.lane.b32.xlu1 %v384_v3, %s1722_s18 }
 0x35f   :  { %v387_v6 = vpop.permute.xlu1 %386 }
 0x360   :  { %1282 = vmatmul.mubr.msk.f32.vlgmr.msra.gmra.mrb[2].mxu0 %vm286_vm3, %v387_v6  ;;  %v111_v6 = vld [vmem:[#allocation2 + $0x48] sm:$0xff] }
 0x361   :  { %1408 = vmatpush3.bf16.msra.mxu0 %v1846_v15  ;;  %1292 = vmatprep.mubr.msk.f32.mxu0 %vm1719_vm0, %v1720_v1 }
 0x362   :  { %1409 = vmatprep.subr.bf16.mxu0 %v1718_v0  ;;  %1196 = vmatprep.mubr.msk.f32.mxu1 %vm148_vm1, %v111_v6 }
 0x365   :  { %1411 = vmatpush3.bf16.msra.mxu0 %v1849_v19 }
 0x366   :  { %1412 = vmatprep.subr.bf16.mxu0 %v1718_v0 }
 0x433   :  { %v456_v8 = vpop.f32.mrb[2].mxu0 }
 0x434   :  { %v460_v9 = vadd.f32 %v456_v8, %v249_v7  ;;  %v1283_v10 = vpop.f32.mrb[3].mxu0  ;;  %v110_v7 = vld [vmem:[#allocation2 + $0x40] sm:$0xff] }
 0x435   :  { %262 = vmatmul.mubr.f32.gmra.mrb[8].mxu1 %v110_v7 }
 0x436   :  { %1488 = vtanh.f32 %v460_v9  ;;  %v1202_v12 = vmul.f32 -1.442695, %v460_v9 }
 0x438   :  { %1490 = vpow2.f32 %v1202_v12 }
 0x440   :  { %v1489_v11 = vpop.eup %1488 }
 0x441   :  { %470 = vrot.lane.b32.xlu0 %v1489_v11, %s1721_s5 }
 0x442   :  { %v1491_v13 = vpop.eup %1490 }
 0x443   :  { %v464_v14 = vadd.f32 1.0, %v1491_v13 }
 0x445   :  { %1492 = vrcp.f32 %v464_v14 }
 0x44f   :  { %v1493_v16 = vpop.eup %1492 }
 0x450   :  { %v468_v20 = vmul.f32 %v1493_v16, %v378_v60 }
 0x4b3   :  { %v471_v17 = vpop.permute.xlu0 %470 }
 0x4b4   :  { %v473_v18 = vmul.f32 %v1493_v16, %v471_v17 }
 0x4b6   :  { %475 = vrot.lane.b32.xlu1 %v473_v18, %s1722_s18 }
 0x508   :  { %v263_v11 = vpop.f32.mrb[8].mxu1 }
 0x509   :  { %v265_v12 = vpop.f32.mrb[9].mxu1  ;;  %v264_v14 = vadd.f32 %v1871_v46, %v263_v11  ;;  %v117_v11 = vld [vmem:[#allocation2 + $0x78] sm:$0xff] }
 0x50a   :  { %v116_v12 = vld [vmem:[#allocation2 + $0x70] sm:$0xff] }
 0x528   :  { %v476_v21 = vpop.permute.xlu1 %475 }
 0x529   :  { %v478_v22 = vadd.f32 %v476_v21, %v468_v20 }
 0x52b   :  { %1494 = vtanh.f32 %v478_v22 }
 0x535   :  { %v1495_v25 = vpop.eup %1494 }
 0x536   :  { %481 = vrot.lane.b32.xlu0 %v1495_v25, %s1721_s5 }
 0x5a8   :  { %v482_v26 = vpop.permute.xlu0 %481 }
 0x5a9   :  { %v484_v27 = vmul.f32 %v1493_v16, %v482_v26 }
 0x5ab   :  { %486 = vrot.lane.b32.xlu1 %v484_v27, %s1722_s18 }
 0x61d   :  { %v487_v30 = vpop.permute.xlu1 %486 }
 0x61e   :  { %1293 = vmatmul.mubr.msk.f32.vlgmr.msra.gmra.mrb[4].mxu0 %vm286_vm3, %v487_v30  ;;  %v113_v30 = vld [vmem:[#allocation2 + $0x58] sm:$0xff] }
 0x61f   :  { %1414 = vmatpush3.bf16.msra.mxu0 %v1846_v15  ;;  %1303 = vmatprep.mubr.msk.f32.mxu0 %vm1719_vm0, %v1720_v1 }
 0x620   :  { %1415 = vmatprep.subr.bf16.mxu0 %v1718_v0  ;;  %1197 = vmatprep.mubr.msk.f32.mxu1 %vm148_vm1, %v113_v30 }
 0x623   :  { %1417 = vmatpush3.bf16.msra.mxu0 %v1849_v19 }
 0x624   :  { %1418 = vmatprep.subr.bf16.mxu0 %v1718_v0 }
 0x6f1   :  { %v556_v32 = vpop.f32.mrb[4].mxu0 }
 0x6f2   :  { %v560_v33 = vadd.f32 %v556_v32, %v254_v31  ;;  %v1294_v34 = vpop.f32.mrb[5].mxu0  ;;  %v112_v31 = vld [vmem:[#allocation2 + $0x50] sm:$0xff] }
 0x6f3   :  { %267 = vmatmul.mubr.f32.gmra.mrb[10].mxu1 %v112_v31 }
 0x6f4   :  { %1496 = vtanh.f32 %v560_v33  ;;  %v1204_v36 = vmul.f32 -1.442695, %v560_v33 }
 0x6f6   :  { %1498 = vpow2.f32 %v1204_v36 }
 0x6fe   :  { %v1497_v35 = vpop.eup %1496 }
 0x6ff   :  { %570 = vrot.lane.b32.xlu0 %v1497_v35, %s1721_s5 }
 0x700   :  { %v1499_v37 = vpop.eup %1498 }
 0x701   :  { %v564_v38 = vadd.f32 1.0, %v1499_v37 }
 0x703   :  { %1500 = vrcp.f32 %v564_v38 }
 0x70d   :  { %v1501_v39 = vpop.eup %1500 }
 0x70e   :  { %v568_v42 = vmul.f32 %v1501_v39, %v478_v22 }
 0x771   :  { %v571_v40 = vpop.permute.xlu0 %570 }
 0x772   :  { %v573_v41 = vmul.f32 %v1501_v39, %v571_v40 }
 0x774   :  { %575 = vrot.lane.b32.xlu1 %v573_v41, %s1722_s18 }
 0x7c6   :  { %v268_v35 = vpop.f32.mrb[10].mxu1 }
 0x7c7   :  { %v270_v36 = vpop.f32.mrb[11].mxu1  ;;  %v269_v38 = vadd.f32 %v1871_v46, %v268_v35  ;;  %v1087_v35 = vld [vmem:[#allocation10 + $0x10] sm:$0xff] }
 0x7e6   :  { %v576_v43 = vpop.permute.xlu1 %575 }
 0x7e7   :  { %v578_v44 = vadd.f32 %v576_v43, %v568_v42 }
 0x7e9   :  { %1502 = vtanh.f32 %v578_v44 }
 0x7f3   :  { %v1503_v48 = vpop.eup %1502 }
 0x7f4   :  { %581 = vrot.lane.b32.xlu0 %v1503_v48, %s1721_s5 }
 0x866   :  { %v582_v49 = vpop.permute.xlu0 %581 }
 0x867   :  { %v584_v50 = vmul.f32 %v1501_v39, %v582_v49 }
 0x869   :  { %586 = vrot.lane.b32.xlu1 %v584_v50, %s1722_s18 }
 0x8db   :  { %v587_v53 = vpop.permute.xlu1 %586 }
 0x8dc   :  { %1304 = vmatmul.mubr.msk.f32.vlgmr.msra.gmra.mrb[6].mxu0 %vm286_vm3, %v587_v53  ;;  %v115_v53 = vld [vmem:[#allocation2 + $0x68] sm:$0xff] }
 0x8dd   :  { %1420 = vmatpush3.bf16.msra.mxu0 %v1846_v15  ;;  %1314 = vmatprep.mubr.msk.f32.mxu0 %vm1719_vm0, %v1720_v1 }
 0x8de   :  { %1421 = vmatprep.subr.bf16.mxu0 %v1718_v0  ;;  %1198 = vmatprep.mubr.msk.f32.mxu1 %vm148_vm1, %v115_v53 }
 0x8e1   :  { %1423 = vmatpush3.bf16.msra.mxu0 %v1849_v19 }
 0x8e2   :  { %1424 = vmatprep.subr.bf16.mxu0 %v1718_v0 }
 0x9af   :  { %v656_v55 = vpop.f32.mrb[6].mxu0 }
 0x9b0   :  { %v660_v56 = vadd.f32 %v656_v55, %v259_v54  ;;  %v1305_v57 = vpop.f32.mrb[7].mxu0  ;;  %v114_v54 = vld [vmem:[#allocation2 + $0x60] sm:$0xff] }
 0x9b1   :  { %272 = vmatmul.mubr.f32.gmra.mrb[12].mxu1 %v114_v54 }
 0x9b2   :  { %1504 = vtanh.f32 %v660_v56  ;;  %v1206_v59 = vmul.f32 -1.442695, %v660_v56  ;;  %1199 = vmatprep.mubr.msk.f32.mxu1 %vm148_vm1, %v117_v11 }
 0x9b4   :  { %1506 = vpow2.f32 %v1206_v59 }
 0x9b5   :  { %277 = vmatmul.mubr.f32.gmra.mrb[14].mxu1 %v116_v12 }
 0x9bc   :  { %v1505_v58 = vpop.eup %1504 }
 0x9bd   :  { %670 = vrot.lane.b32.xlu0 %v1505_v58, %s1721_s5 }
 0x9be   :  { %v1507_v60 = vpop.eup %1506 }
 0x9bf   :  { %v664_v61 = vadd.f32 1.0, %v1507_v60 }
 0x9c1   :  { %1508 = vrcp.f32 %v664_v61 }
 0x9cb   :  { %v1509_v62 = vpop.eup %1508 }
 0x9cc   :  { %v668_v3 = vmul.f32 %v1509_v62, %v578_v44 }
 0xa2f   :  { %v671_v63 = vpop.permute.xlu0 %670 }
 0xa30   :  { %v673_v2 = vmul.f32 %v1509_v62, %v671_v63 }
 0xa32   :  { %675 = vrot.lane.b32.xlu1 %v673_v2, %s1722_s18 }
 0xa84   :  { %v273_v58 = vpop.f32.mrb[12].mxu1 }
 0xa85   :  { %v275_v59 = vpop.f32.mrb[13].mxu1  ;;  %v274_v61 = vadd.f32 %v1871_v46, %v273_v58 }
 0xaa4   :  { %v676_v4 = vpop.permute.xlu1 %675 }
 0xaa5   :  { %v678_v5 = vadd.f32 %v676_v4, %v668_v3 }
 0xaa7   :  { %1510 = vtanh.f32 %v678_v5 }
 0xab1   :  { %v1511_v8 = vpop.eup %1510 }
 0xab2   :  { %681 = vrot.lane.b32.xlu0 %v1511_v8, %s1721_s5 }
 0xb24   :  { %v682_v9 = vpop.permute.xlu0 %681 }
 0xb25   :  { %v684_v10 = vmul.f32 %v1509_v62, %v682_v9 }
 0xb27   :  { %686 = vrot.lane.b32.xlu1 %v684_v10, %s1722_s18 }
 0xb99   :  { %v687_v13 = vpop.permute.xlu1 %686 }
 0xb9a   :  { %1315 = vmatmul.mubr.msk.f32.vlgmr.msra.gmra.mrb[8].mxu0 %vm286_vm3, %v687_v13 }
 0xb9b   :  { %1426 = vmatpush3.bf16.msra.mxu0 %v1846_v15  ;;  %1325 = vmatprep.mubr.msk.f32.mxu0 %vm1719_vm0, %v1720_v1 }
 0xb9c   :  { %1427 = vmatprep.subr.bf16.mxu0 %v1718_v0 }
 0xb9f   :  { %1429 = vmatpush3.bf16.msra.mxu0 %v1849_v19 }
 0xba0   :  { %1430 = vmatprep.subr.bf16.mxu0 %v1718_v0 }
 0xc6d   :  { %v756_v16 = vpop.f32.mrb[8].mxu0 }
 0xc6e   :  { %v760_v17 = vadd.f32 %v756_v16, %v264_v14  ;;  %v1316_v18 = vpop.f32.mrb[9].mxu0 }
 0xc70   :  { %1512 = vtanh.f32 %v760_v17  ;;  %v1208_v21 = vmul.f32 -1.442695, %v760_v17  ;;  %v278_v17 = vpop.f32.mrb[14].mxu1 }
 0xc71   :  { %v280_v18 = vpop.f32.mrb[15].mxu1 }
 0xc72   :  { %1514 = vpow2.f32 %v1208_v21  ;;  %v279_v21 = vadd.f32 %v1871_v46, %v278_v17 }
 0xc7a   :  { %v1513_v20 = vpop.eup %1512 }
 0xc7b   :  { %770 = vrot.lane.b32.xlu0 %v1513_v20, %s1721_s5 }
 0xc7c   :  { %v1515_v22 = vpop.eup %1514 }
 0xc7d   :  { %v764_v23 = vadd.f32 1.0, %v1515_v22 }
 0xc7f   :  { %1516 = vrcp.f32 %v764_v23 }
 0xc89   :  { %v1517_v24 = vpop.eup %1516 }
 0xc8a   :  { %v768_v27 = vmul.f32 %v1517_v24, %v678_v5 }
 0xced   :  { %v771_v25 = vpop.permute.xlu0 %770 }
 0xcee   :  { %v773_v26 = vmul.f32 %v1517_v24, %v771_v25 }
 0xcf0   :  { %775 = vrot.lane.b32.xlu1 %v773_v26, %s1722_s18 }
 0xd62   :  { %v776_v28 = vpop.permute.xlu1 %775 }
 0xd63   :  { %v778_v29 = vadd.f32 %v776_v28, %v768_v27 }
 0xd65   :  { %1518 = vtanh.f32 %v778_v29 }
 0xd6f   :  { %v1519_v32 = vpop.eup %1518 }
 0xd70   :  { %781 = vrot.lane.b32.xlu0 %v1519_v32, %s1721_s5 }
 0xde2   :  { %v782_v33 = vpop.permute.xlu0 %781 }
 0xde3   :  { %v784_v34 = vmul.f32 %v1517_v24, %v782_v33  ;;  %v1085_v33 = vld [vmem:[#allocation10] sm:$0xff] }
 0xde5   :  { %786 = vrot.lane.b32.xlu1 %v784_v34, %s1722_s18  ;;  %v1086_v34 = vld [vmem:[#allocation10 + $0x8] sm:$0xff] }
 0xde6   :  { %v1443_v36 = vpack.c.bf16 %v1086_v34, %v1085_v33 }
 0xe57   :  { %v787_v37 = vpop.permute.xlu1 %786 }
 0xe58   :  { %1326 = vmatmul.mubr.msk.f32.vlgmr.msra.gmra.mrb[10].mxu0 %vm286_vm3, %v787_v37  ;;  %v1088_v37 = vld [vmem:[#allocation10 + $0x18] sm:$0xff] }
 0xe59   :  { %1432 = vmatpush3.bf16.msra.mxu0 %v1846_v15  ;;  %1336 = vmatprep.mubr.msk.f32.mxu0 %vm1719_vm0, %v1720_v1 }
 0xe5a   :  { %1433 = vmatprep.subr.bf16.mxu0 %v1718_v0 }
 0xe5d   :  { %1435 = vmatpush3.bf16.msra.mxu0 %v1849_v19 }
 0xe5e   :  { %1436 = vmatprep.subr.bf16.mxu0 %v1718_v0 }
 0xf2b   :  { %v856_v39 = vpop.f32.mrb[10].mxu0 }
 0xf2c   :  { %v860_v40 = vadd.f32 %v856_v39, %v269_v38  ;;  %v1327_v41 = vpop.f32.mrb[11].mxu0  ;;  %v1446_v38 = vpack.c.bf16 %v1088_v37, %v1087_v35 }
 0xf2e   :  { %1520 = vtanh.f32 %v860_v40  ;;  %v1210_v43 = vmul.f32 -1.442695, %v860_v40 }
 0xf30   :  { %1522 = vpow2.f32 %v1210_v43  ;;  %v1215_v43 = vld [vmem:[#allocation11] ss:$0 sm:$0xff] }
 0xf38   :  { %v1521_v42 = vpop.eup %1520 }
 0xf39   :  { %870 = vrot.lane.b32.xlu0 %v1521_v42, %s1721_s5 }
 0xf3a   :  { %v1523_v44 = vpop.eup %1522 }
 0xf3b   :  { %v864_v45 = vadd.f32 1.0, %v1523_v44 }
 0xf3d   :  { %1524 = vrcp.f32 %v864_v45 }
 0xf47   :  { %v1525_v47 = vpop.eup %1524 }
 0xf48   :  { %v868_v50 = vmul.f32 %v1525_v47, %v778_v29 }
 0xfab   :  { %v871_v48 = vpop.permute.xlu0 %870 }
 0xfac   :  { %v873_v49 = vmul.f32 %v1525_v47, %v871_v48 }
 0xfae   :  { %875 = vrot.lane.b32.xlu1 %v873_v49, %s1722_s18 }
0x1020   :  { %v876_v51 = vpop.permute.xlu1 %875 }
0x1021   :  { %v878_v52 = vadd.f32 %v876_v51, %v868_v50 }
0x1023   :  { %1526 = vtanh.f32 %v878_v52 }
0x102d   :  { %v1527_v55 = vpop.eup %1526 }
0x102e   :  { %881 = vrot.lane.b32.xlu0 %v1527_v55, %s1721_s5 }
0x10a0   :  { %v882_v56 = vpop.permute.xlu0 %881 }
0x10a1   :  { %v884_v57 = vmul.f32 %v1525_v47, %v882_v56 }
0x10a3   :  { %886 = vrot.lane.b32.xlu1 %v884_v57, %s1722_s18 }
0x1115   :  { %v887_v60 = vpop.permute.xlu1 %886 }
0x1116   :  { %1337 = vmatmul.mubr.msk.f32.vlgmr.msra.gmra.mrb[12].mxu0 %vm286_vm3, %v887_v60 }
0x1117   :  { %1438 = vmatpush3.bf16.msra.mxu0 %v1846_v15  ;;  %1347 = vmatprep.mubr.msk.f32.mxu0 %vm1719_vm0, %v1720_v1 }
0x1118   :  { %1439 = vmatprep.subr.bf16.mxu0 %v1718_v0 }
0x111b   :  { %1441 = vmatpush3.bf16.msra.mxu0 %v1849_v19 }
0x111c   :  { %1442 = vmatprep.subr.bf16.mxu0 %v1718_v0 }
0x11e9   :  { %v956_v62 = vpop.f32.mrb[12].mxu0 }
0x11ea   :  { %v960_v63 = vadd.f32 %v956_v62, %v274_v61  ;;  %v1338_v2 = vpop.f32.mrb[13].mxu0 }
0x11ec   :  { %1528 = vtanh.f32 %v960_v63  ;;  %v1212_v4 = vmul.f32 -1.442695, %v960_v63 }
0x11ee   :  { %1530 = vpow2.f32 %v1212_v4 }
0x11f6   :  { %v1529_v3 = vpop.eup %1528 }
0x11f7   :  { %970 = vrot.lane.b32.xlu0 %v1529_v3, %s1721_s5 }
0x11f8   :  { %v1531_v15 = vpop.eup %1530 }
0x11f9   :  { %v964_v5 = vadd.f32 1.0, %v1531_v15 }
0x11fb   :  { %1532 = vrcp.f32 %v964_v5 }
0x1205   :  { %v1533_v6 = vpop.eup %1532 }
0x1206   :  { %v968_v19 = vmul.f32 %v1533_v6, %v878_v52 }
0x1269   :  { %v971_v7 = vpop.permute.xlu0 %970 }
0x126a   :  { %v973_v8 = vmul.f32 %v1533_v6, %v971_v7 }
0x126c   :  { %975 = vrot.lane.b32.xlu1 %v973_v8, %s1722_s18 }
0x12de   :  { %v976_v9 = vpop.permute.xlu1 %975 }
0x12df   :  { %v978_v10 = vadd.f32 %v976_v9, %v968_v19 }
0x12e1   :  { %1534 = vtanh.f32 %v978_v10 }
0x12eb   :  { %v1535_v13 = vpop.eup %1534 }
0x12ec   :  { %981 = vrot.lane.b32.xlu0 %v1535_v13, %s1721_s5 }
0x135e   :  { %v982_v14 = vpop.permute.xlu0 %981 }
0x135f   :  { %v984_v16 = vmul.f32 %v1533_v6, %v982_v14 }
0x1361   :  { %986 = vrot.lane.b32.xlu1 %v984_v16, %s1722_s18 }
0x13d3   :  { %v987_v20 = vpop.permute.xlu1 %986 }
0x13d4   :  { %1348 = vmatmul.mubr.msk.f32.vlgmr.msra.gmra.mrb[14].mxu0 %vm286_vm3, %v987_v20 }
0x13d5   :  { %1358 = vmatprep.mubr.msk.f32.mxu0 %vm1719_vm0, %v1720_v1  ;;  %1444 = vmatpush3.bf16.msra.mxu0 %v1443_v36 }
0x13d6   :  { %1445 = vmatprep.subr.bf16.mxu0 %v1718_v0 }
0x13d9   :  { %1447 = vmatpush3.bf16.msra.mxu0 %v1446_v38 }
0x14a7   :  { %v1056_v22 = vpop.f32.mrb[14].mxu0 }
0x14a8   :  { %v1060_v23 = vadd.f32 %v1056_v22, %v279_v21  ;;  %v1349_v24 = vpop.f32.mrb[15].mxu0 }
0x14aa   :  { %1536 = vtanh.f32 %v1060_v23  ;;  %v1214_v26 = vmul.f32 -1.442695, %v1060_v23 }
0x14ac   :  { %1538 = vpow2.f32 %v1214_v26 }
0x14b4   :  { %v1537_v25 = vpop.eup %1536 }
0x14b5   :  { %1070 = vrot.lane.b32.xlu0 %v1537_v25, %s1721_s5 }
0x14b6   :  { %v1539_v27 = vpop.eup %1538 }
0x14b7   :  { %v1064_v28 = vadd.f32 1.0, %v1539_v27 }
0x14b9   :  { %1540 = vrcp.f32 %v1064_v28 }
0x14c3   :  { %v1541_v29 = vpop.eup %1540 }
0x14c4   :  { %v1068_v1 = vmul.f32 %v1541_v29, %v978_v10 }
0x1527   :  { %v1071_v30 = vpop.permute.xlu0 %1070 }
0x1528   :  { %v1073_v31 = vmul.f32 %v1541_v29, %v1071_v30 }
0x152a   :  { %1075 = vrot.lane.b32.xlu1 %v1073_v31, %s1722_s18 }
0x159c   :  { %v1076_v32 = vpop.permute.xlu1 %1075 }
0x159d   :  { %v1078_v46 = vadd.f32 %v1076_v32, %v1068_v1 }
0x159f   :  { %1542 = vtanh.f32 %v1078_v46 }
0x15a9   :  { %v1543_v39 = vpop.eup %1542 }
0x15aa   :  { %1081 = vrot.lane.b32.xlu0 %v1543_v39, %s1721_s5 }
0x161c   :  { %v1082_v40 = vpop.permute.xlu0 %1081 }
0x161d   :  { %v1084_v41 = vmul.f32 %v1541_v29, %v1082_v40 }
0x161f   :  { %1097 = vrot.lane.b32.xlu1 %v1084_v41, %s1722_s18 }
0x1691   :  { %v1098_v42 = vpop.permute.xlu1 %1097 }
0x1692   :  { %1359 = vmatmul.mubr.msk.f32.vlgmr.msra.gmra.mrb[16].mxu0 %vm286_vm3, %v1098_v42 }
0x1765   :  { %v1167_v44 = vpop.f32.mrb[16].mxu0 }
0x1766   :  { %v1168_v45 = vadd.f32 %v1215_v43, %v1167_v44  ;;  %v1360_v47 = vpop.f32.mrb[17].mxu0 }
0x1768   :  { %1171 = vst [vmem:[#allocation13] sm:$0xff] %v1168_v45 }
0x1769   :  { %1687 = shalt.err (!%p1684_p10)
}
0x176a   :  { %s1688_s26 = scalar_lea.hbm %s1985_s6, 128 }
0x176b   :  { %p1689_p11 = scmp.ne.s32.totalorder %s1985_s6, %s1688_s26  ;;  %p1692_p12 = scmp.lt.u32.totalorder %s1688_s26, %s1985_s6 }
0x176d   :  { %p1694_p13 = pnand %p1692_p12, %p1689_p11 }
0x176f   :  { %1697 = shalt.err (!%p1694_p13)
}
0x1770   :  { %1181 = dma.vmem_to_hbm [thread:$0]  %s1179_s24, 128, %s1985_s6, [#allocation4]  }
0x1771   :  { %1706 = dma.done.wait [#allocation4], 128  }
0x1772   :  { %1707 = vsyncadd [#allocation4], 4294967168 }
0x1773   :  { %1185 = vsyncpa [#allocation3], 1 }
0x1774   :  { %1186 = vsyncpa [#allocation6], 1 }
0x1775   :  { %1187 = vsyncpa [#allocation9], 1 }
0x1776   :  { %1188 = vsyncpa [#allocation12], 1 }
0x1777   :  { %1189 = vsyncpa [#allocation4], 1 }

</bundles_post_ra>
